<compile_context>
chip_gen: v5e
topology: v5e:2x2
jax: 0.10.0
libtpu: 0.0.40
codegen_flags: <defaults>
</compile_context>

<pallas_src>
import jax
import jax.numpy as jnp
from jax.experimental import pallas as pl
from jax.experimental.pallas import tpu as pltpu

STATE_SIZE = 32    # state_size passed to CriticNetwork.__init__
HIDDEN = 128
BATCH = 8
MAX_TILE_B = 256   # batch tile per grid step for large batches (fills MXU N dim)


def _round_up(x, m):
    return ((x + m - 1) // m) * m


def critic_kernel(xT_ref, w1_ref, b1_ref, w2_ref, b2_ref, w3_ref, b3_ref, out_ref):
    """Fused 3-layer MLP, batch on the lane axis.

    xT:  (S, TILE_B)  f32      w1: (H, S)  bf16   b1: (H, 1) f32
    w2:  (H, H)       bf16     b2: (H, 1)  f32
    w3:  (H, 1)       f32      b3: (1,)    f32 (SMEM scalar)
    out: (1, TILE_B)  f32
    """
    xT = xT_ref[...].astype(jnp.bfloat16)                       # bf16 MXU operand

    # fc1: (H, S) @ (S, TILE_B) -> (H, TILE_B), f32 accumulate, f32 bias + relu
    h1 = jnp.dot(w1_ref[...], xT, preferred_element_type=jnp.float32) + b1_ref[...]
    h1 = jnp.maximum(h1, 0.0)

    # fc2: (H, H) @ (H, TILE_B) -> (H, TILE_B)
    h2 = jnp.dot(w2_ref[...], h1.astype(jnp.bfloat16),
                 preferred_element_type=jnp.float32) + b2_ref[...]
    h2 = jnp.maximum(h2, 0.0)

    # critic head: VPU multiply + sublane (XLU) reduction instead of an N=1 matmul.
    v = jnp.sum(h2 * w3_ref[...], axis=0, keepdims=True) + b3_ref[0]   # (1, TILE_B)
    out_ref[...] = v.astype(out_ref.dtype)


@jax.jit
def critic_forward(state, w1, b1, w2, b2, w3, b3):
    """state: (B, S) f32.  Params in PyTorch layout:
       w1 (H, S) bf16, b1 (H,) f32, w2 (H, H) bf16, b2 (H,) f32,
       w3 (H,) f32 (critic.weight row), b3 () f32.  Returns (B, 1) f32."""
    B, S = state.shape
    H = w1.shape[0]

    # Adaptive batch tiling: one grid-less block when small, 256-wide tiles when big.
    b8 = _round_up(B, 8)
    if b8 <= MAX_TILE_B:
        tile_b, b_pad = b8, b8
    else:
        tile_b, b_pad = MAX_TILE_B, _round_up(B, MAX_TILE_B)

    xT = jnp.pad(state.T, ((0, 0), (0, b_pad - B)))              # (S, B_pad), batch on lanes
    b1c = b1.reshape(H, 1)
    b2c = b2.reshape(H, 1)
    w3c = w3.reshape(H, 1).astype(jnp.float32)
    b3s = b3.reshape(1).astype(jnp.float32)

    grid = (b_pad // tile_b,)

    out_row = pl.pallas_call(
        critic_kernel,
        out_shape=jax.ShapeDtypeStruct((1, b_pad), jnp.float32),
        grid=grid,
        in_specs=[
            pl.BlockSpec((S, tile_b), lambda i: (0, i)),          # state^T tile
            pl.BlockSpec((H, S), lambda i: (0, 0)),               # W1 (resident)
            pl.BlockSpec((H, 1), lambda i: (0, 0)),               # b1
            pl.BlockSpec((H, H), lambda i: (0, 0)),               # W2 (resident)
            pl.BlockSpec((H, 1), lambda i: (0, 0)),               # b2
            pl.BlockSpec((H, 1), lambda i: (0, 0)),               # w3 column
            pl.BlockSpec(memory_space=pltpu.MemorySpace.SMEM),    # b3 scalar in SMEM
        ],
        out_specs=pl.BlockSpec((1, tile_b), lambda i: (0, i)),    # lane-dense value row
        compiler_params=pltpu.CompilerParams(
            dimension_semantics=("parallel",)),
    )(xT, w1, b1c, w2, b2c, w3c, b3s)

    return out_row[0, :B].reshape(B, 1)


def init_params(key, state_size, hidden):
    """Deterministic init mimicking nn.Linear default U[-1/sqrt(fan_in), +1/sqrt(fan_in)].
    Weights kept in PyTorch (out, in) layout; matmul weights stored as bf16."""
    ks = jax.random.split(key, 6)

    def lin(kw, kb, fan_in, fan_out):
        bound = 1.0 / jnp.sqrt(fan_in)
        w = jax.random.uniform(kw, (fan_out, fan_in), jnp.float32, -bound, bound)
        b = jax.random.uniform(kb, (fan_out,), jnp.float32, -bound, bound)
        return w, b

    w1, b1 = lin(ks[0], ks[1], state_size, hidden)
    w2, b2 = lin(ks[2], ks[3], hidden, hidden)
    w3, b3 = lin(ks[4], ks[5], hidden, 1)
    return (w1.astype(jnp.bfloat16), b1,
            w2.astype(jnp.bfloat16), b2,
            w3.reshape(-1), b3.reshape(()))


def reference_forward(state, w1, b1, w2, b2, w3, b3):
    """Pure-JAX reference with the same dtype policy (bf16 MXU operands, f32 accum)."""
    h1 = jnp.dot(state.astype(jnp.bfloat16), w1.T,
                 preferred_element_type=jnp.float32) + b1
    h1 = jnp.maximum(h1, 0.0)
    h2 = jnp.dot(h1.astype(jnp.bfloat16), w2.T,
                 preferred_element_type=jnp.float32) + b2
    h2 = jnp.maximum(h2, 0.0)
    return h2 @ w3.astype(jnp.float32).reshape(-1, 1) + b3


if __name__ == "__main__":
    key = jax.random.PRNGKey(0)
    k_state, k_params = jax.random.split(key)

    state = jax.random.normal(k_state, (BATCH, STATE_SIZE), jnp.float32)
    params = init_params(k_params, STATE_SIZE, HIDDEN)

    value = critic_forward(state, *params)
    jax.block_until_ready(value)

    ref = reference_forward(state, *params)
    assert value.shape == (BATCH, 1), value.shape
    max_err = jnp.max(jnp.abs(value - ref))
    assert max_err < 5e-3, f"max abs err {max_err}"

    print("KERNEL_OK")
</pallas_src>

<mosaic_0001>
module attributes {stable_mosaic.version = 11 : i64} {
  func.func @critic_kernel(%arg0: i32, %arg1: memref<32x8xf32, #tpu.memory_space<vmem>>, %arg2: memref<128x32xbf16, #tpu.memory_space<vmem>>, %arg3: memref<128x1xf32, #tpu.memory_space<vmem>>, %arg4: memref<128x128xbf16, #tpu.memory_space<vmem>>, %arg5: memref<128x1xf32, #tpu.memory_space<vmem>>, %arg6: memref<128x1xf32, #tpu.memory_space<vmem>>, %arg7: memref<1xf32, #tpu.memory_space<smem>>, %arg8: memref<1x8xf32, #tpu.memory_space<vmem>>) attributes {dimension_semantics = [#tpu.dimension_semantics<parallel>], iteration_bounds = array<i64: 1>, scalar_prefetch = 0 : i64, scratch_operands = 0 : i64, tpu.core_type = #tpu.core_type<tc>, window_params = [{transform_indices = @transform_0, window_bounds = array<i64: 32, 8>}, {pipeline_mode = #tpu.pipeline_mode<synchronous>, transform_indices = @transform_1, window_bounds = array<i64: 128, 32>}, {pipeline_mode = #tpu.pipeline_mode<synchronous>, transform_indices = @transform_2, window_bounds = array<i64: 128, 1>}, {pipeline_mode = #tpu.pipeline_mode<synchronous>, transform_indices = @transform_3, window_bounds = array<i64: 128, 128>}, {pipeline_mode = #tpu.pipeline_mode<synchronous>, transform_indices = @transform_4, window_bounds = array<i64: 128, 1>}, {pipeline_mode = #tpu.pipeline_mode<synchronous>, transform_indices = @transform_5, window_bounds = array<i64: 128, 1>}, {transform_indices = @transform_6, window_bounds = array<i64: 1>}, {transform_indices = @transform_7, window_bounds = array<i64: 1, 8>}]} {
    %c0 = arith.constant 0 : index
    %c0_0 = arith.constant 0 : index
    %0 = vector.load %arg1[%c0, %c0_0] : memref<32x8xf32, #tpu.memory_space<vmem>>, vector<32x8xf32>
    %1 = arith.truncf %0 : vector<32x8xf32> to vector<32x8xbf16>
    %c0_1 = arith.constant 0 : index
    %c0_2 = arith.constant 0 : index
    %2 = vector.load %arg2[%c0_1, %c0_2] : memref<128x32xbf16, #tpu.memory_space<vmem>>, vector<128x32xbf16>
    %cst = arith.constant dense<0.000000e+00> : vector<128x8xf32>
    %3 = tpu.matmul %2, %1, %cst {dimension_numbers = #tpu.dot_dimension_numbers<[1], [0], [0], [1], [0, 0, 1, 1], [], []>} : vector<128x32xbf16>, vector<32x8xbf16>, vector<128x8xf32> -> vector<128x8xf32>
    %c0_3 = arith.constant 0 : index
    %c0_4 = arith.constant 0 : index
    %4 = vector.load %arg3[%c0_3, %c0_4] : memref<128x1xf32, #tpu.memory_space<vmem>>, vector<128x1xf32>
    %5 = vector.broadcast %4 : vector<128x1xf32> to vector<128x8xf32>
    %6 = arith.addf %3, %5 : vector<128x8xf32>
    %cst_5 = arith.constant 0.000000e+00 : f32
    %7 = vector.broadcast %cst_5 : f32 to vector<128x8xf32>
    %8 = arith.maximumf %6, %7 : vector<128x8xf32>
    %c0_6 = arith.constant 0 : index
    %c0_7 = arith.constant 0 : index
    %9 = vector.load %arg4[%c0_6, %c0_7] : memref<128x128xbf16, #tpu.memory_space<vmem>>, vector<128x128xbf16>
    %10 = arith.truncf %8 : vector<128x8xf32> to vector<128x8xbf16>
    %cst_8 = arith.constant dense<0.000000e+00> : vector<128x8xf32>
    %11 = tpu.matmul %9, %10, %cst_8 {dimension_numbers = #tpu.dot_dimension_numbers<[1], [0], [0], [1], [0, 0, 1, 1], [], []>} : vector<128x128xbf16>, vector<128x8xbf16>, vector<128x8xf32> -> vector<128x8xf32>
    %c0_9 = arith.constant 0 : index
    %c0_10 = arith.constant 0 : index
    %12 = vector.load %arg5[%c0_9, %c0_10] : memref<128x1xf32, #tpu.memory_space<vmem>>, vector<128x1xf32>
    %13 = vector.broadcast %12 : vector<128x1xf32> to vector<128x8xf32>
    %14 = arith.addf %11, %13 : vector<128x8xf32>
    %cst_11 = arith.constant 0.000000e+00 : f32
    %15 = vector.broadcast %cst_11 : f32 to vector<128x8xf32>
    %16 = arith.maximumf %14, %15 : vector<128x8xf32>
    %c0_12 = arith.constant 0 : index
    %c0_13 = arith.constant 0 : index
    %17 = vector.load %arg6[%c0_12, %c0_13] : memref<128x1xf32, #tpu.memory_space<vmem>>, vector<128x1xf32>
    %18 = vector.broadcast %17 : vector<128x1xf32> to vector<128x8xf32>
    %19 = arith.mulf %16, %18 : vector<128x8xf32>
    %cst_14 = arith.constant dense<0.000000e+00> : vector<8xf32>
    %20 = vector.multi_reduction <add>, %19, %cst_14 [0] : vector<128x8xf32> to vector<8xf32>
    %21 = vector.shape_cast %20 : vector<8xf32> to vector<1x8xf32>
    %c0_15 = arith.constant 0 : index
    %22 = memref.load %arg7[%c0_15] : memref<1xf32, #tpu.memory_space<smem>>
    %23 = vector.broadcast %22 : f32 to vector<1x8xf32>
    %24 = arith.addf %21, %23 : vector<1x8xf32>
    %c0_16 = arith.constant 0 : index
    %c0_17 = arith.constant 0 : index
    %25 = vector.load %arg8[%c0_16, %c0_17] : memref<1x8xf32, #tpu.memory_space<vmem>>, vector<1x8xf32>
    tpu.vector_store %arg8[%c0_16, %c0_17], %24 {strides = array<i32>} : memref<1x8xf32, #tpu.memory_space<vmem>>, vector<1x8xf32>,
    return
  }
  func.func @transform_0(%arg0: i32) -> (i32, i32) {
    %c0_i32 = arith.constant 0 : i32
    %c0_i32_0 = arith.constant 0 : i32
    return %c0_i32, %arg0 : i32, i32
  }
  func.func @transform_1(%arg0: i32) -> (i32, i32) {
    %c0_i32 = arith.constant 0 : i32
    %c0_i32_0 = arith.constant 0 : i32
    %c0_i32_1 = arith.constant 0 : i32
    return %c0_i32, %c0_i32_0 : i32, i32
  }
  func.func @transform_2(%arg0: i32) -> (i32, i32) {
    %c0_i32 = arith.constant 0 : i32
    %c0_i32_0 = arith.constant 0 : i32
    %c0_i32_1 = arith.constant 0 : i32
    return %c0_i32, %c0_i32_0 : i32, i32
  }
  func.func @transform_3(%arg0: i32) -> (i32, i32) {
    %c0_i32 = arith.constant 0 : i32
    %c0_i32_0 = arith.constant 0 : i32
    %c0_i32_1 = arith.constant 0 : i32
    return %c0_i32, %c0_i32_0 : i32, i32
  }
  func.func @transform_4(%arg0: i32) -> (i32, i32) {
    %c0_i32 = arith.constant 0 : i32
    %c0_i32_0 = arith.constant 0 : i32
    %c0_i32_1 = arith.constant 0 : i32
    return %c0_i32, %c0_i32_0 : i32, i32
  }
  func.func @transform_5(%arg0: i32) -> (i32, i32) {
    %c0_i32 = arith.constant 0 : i32
    %c0_i32_0 = arith.constant 0 : i32
    %c0_i32_1 = arith.constant 0 : i32
    return %c0_i32, %c0_i32_0 : i32, i32
  }
  func.func @transform_6(%arg0: i32) -> i32 {
    %c0_i32 = arith.constant 0 : i32
    %c0_i32_0 = arith.constant 0 : i32
    return %c0_i32 : i32
  }
  func.func @transform_7(%arg0: i32) -> (i32, i32) {
    %c0_i32 = arith.constant 0 : i32
    %c0_i32_0 = arith.constant 0 : i32
    return %c0_i32, %arg0 : i32, i32
  }
}

</mosaic_0001>

<bundles_post_ra>
// kernel: critic_forward.1
= control target key start
LH: loop header
LB: loop body
LE: loop exit
PB: predicated region body
PF: predicated region fallthrough
CT: control target
= control target key end

     0   :  { %v810_v3 = vmov 0   ;;  %s1114_s0 = inlined_call_operand.vmem [shape: f32[32,8], index: 0, kind: input, shape index: {}]   ;;  %s1115_s1 = inlined_call_operand.vmem [shape: bf16[128,32], index: 1, kind: input, shape index: {}]   ;;  %s1116_s2 = inlined_call_operand.vmem [shape: f32[128,1], index: 2, kind: input, shape index: {}]   ;;  %s1117_s3 = inlined_call_operand.vmem [shape: bf16[128,128], index: 3, kind: input, shape index: {}]   ;;  %s1118_s4 = inlined_call_operand.vmem [shape: f32[128,1], index: 4, kind: input, shape index: {}]   ;;  %s1119_s5 = inlined_call_operand.vmem [shape: f32[128,1], index: 5, kind: input, shape index: {}]   ;;  %s1120_s6 = inlined_call_operand.<no memory space> [shape: f32[1], index: 6, kind: input, shape index: {}]   ;;  %s1121_s7 = inlined_call_operand.hbm [shape: f32[1,8], index: 7, kind: output, shape index: {}]  }
   0x1   :  { %v65_v0 = vld [vmem:[%s1116_s2 + $0x70] sm:$0xff]  ;;  %v63_v1 = vld [vmem:[%s1116_s2 + $0x60] sm:$0xff]  ;;  %783 = vset.pattern.permute.xlu2 %v810_v3  ;;  %782 = vset.pattern.permute.xlu1 %v810_v3  ;;  %v32_v5 = vld [vmem:[%s1114_s0 + $0x18] sm:$0xff] }
   0x2   :  { %v61_v2 = vld [vmem:[%s1116_s2 + $0x50] sm:$0xff]  ;;  %v29_v6 = vld [vmem:[%s1114_s0] sm:$0xff]  ;;  %781 = vset.pattern.permute.xlu0 %v810_v3  ;;  %129 = vperm.xlu1 %782, %v63_v1   ;;  %v30_v8 = vld [vmem:[%s1114_s0 + $0x8] sm:$0xff] }
   0x3   :  { %v31_v4 = vld [vmem:[%s1114_s0 + $0x10] sm:$0xff]  ;;  %139 = vperm.xlu0 %781, %v65_v0   ;;  %119 = vperm.xlu2 %783, %v61_v2   ;;  %v33_v9 = vpack.c.bf16 %v30_v8, %v29_v6  ;;  %v66_v10 = vld [vmem:[%s1116_s2 + $0x78] sm:$0xff]  ;;  %v64_v11 = vld [vmem:[%s1116_s2 + $0x68] sm:$0xff] }
   0x4   :  { %v34_v7 = vpack.c.bf16 %v32_v5, %v31_v4  ;;  %v62_v12 = vld [vmem:[%s1116_s2 + $0x58] sm:$0xff]  ;;  %v753_v13 = vld [vmem:[%s1115_s1] sm:$0xff]  ;;  %v758_v14 = vld [vmem:[%s1115_s1 + $0x28] sm:$0xff] }
   0x6   :  { %218 = vmatpush.bf16.msra.mxu0 %v34_v7  ;;  %769 = vmatpush.bf16.msra.mxu3 %v34_v7 }
   0xa   :  { %219 = vmatpush.bf16.msra.mxu0 %v33_v9  ;;  %770 = vmatpush.bf16.msra.mxu3 %v33_v9 }
   0xb   :  { %13 = vsyncpa [#allocation4], 0  ;;  %vm187_vm0 = vcmask 261120   ;;  %134 = vperm.xlu1 %782, %v64_v11   ;;  %144 = vperm.xlu0 %781, %v66_v10   ;;  %v60_v15 = vld [vmem:[%s1116_s2 + $0x48] sm:$0xff]  ;;  %v59_v16 = vld [vmem:[%s1116_s2 + $0x40] sm:$0xff]  ;;  %vm622_vm1 = vcmask 64512  }
   0xc   :  { %124 = vperm.xlu2 %783, %v62_v12   ;;  %v57_v17 = vld [vmem:[%s1116_s2 + $0x30] sm:$0xff]  ;;  %v58_v18 = vld [vmem:[%s1116_s2 + $0x38] sm:$0xff]  ;;  %v55_v19 = vld [vmem:[%s1116_s2 + $0x20] sm:$0xff]  ;;  %s811_s9 = smov [#allocation3]   ;;  %s672_s13 = sshll.u32 %s1121_s7, 4  ;;  %vm663_vm2 = vcmask 57344   ;;  %s673_s13 = int_to_ptr.hbm [resolvable:$true] %s672_s13 }
   0xd   :  { %713 = vmatmul.msk.bf16.vlgmr.msra.gmra.mxu0 %vm187_vm0, %v753_v13  ;;  %718 = vmatmul.msk.bf16.vlgmr.msra.gmra.mxu3 %vm187_vm0, %v758_v14  ;;  %v56_v20 = vld [vmem:[%s1116_s2 + $0x28] sm:$0xff]  ;;  %v759_v22 = vld [vmem:[%s1115_s1 + $0x30] sm:$0xff]  ;;  %v54_v23 = vld [vmem:[%s1116_s2 + $0x18] sm:$0xff]  ;;  %s670_s10 = sshll.u32 %s811_s9, 4  ;;  %s671_s10 = int_to_ptr.vmem [resolvable:$true] %s670_s10 }
   0xe   :  { %v754_v21 = vld [vmem:[%s1115_s1 + $0x8] sm:$0xff]  ;;  %v53_v24 = vld [vmem:[%s1116_s2 + $0x10] sm:$0xff]  ;;  %v51_v25 = vld [vmem:[%s1116_s2] sm:$0xff] }
   0xf   :  { %v301_v26 = vld [vmem:[%s1118_s4] sm:$0xff]  ;;  %v52_v27 = vld [vmem:[%s1116_s2 + $0x8] sm:$0xff]  ;;  %v755_v29 = vld [vmem:[%s1115_s1 + $0x10] sm:$0xff] }
  0x10   :  { %v302_v28 = vld [vmem:[%s1118_s4 + $0x8] sm:$0xff]  ;;  %v760_v30 = vld [vmem:[%s1115_s1 + $0x38] sm:$0xff]  ;;  %v303_v32 = vld [vmem:[%s1118_s4 + $0x10] sm:$0xff] }
  0x11   :  { %v304_v31 = vld [vmem:[%s1118_s4 + $0x18] sm:$0xff]  ;;  %v305_v33 = vld [vmem:[%s1118_s4 + $0x20] sm:$0xff]  ;;  %v307_v34 = vld [vmem:[%s1118_s4 + $0x30] sm:$0xff] }
  0x12   :  { %v306_v35 = vld [vmem:[%s1118_s4 + $0x28] sm:$0xff]  ;;  %v308_v36 = vld [vmem:[%s1118_s4 + $0x38] sm:$0xff]  ;;  %v309_v39 = vld [vmem:[%s1118_s4 + $0x40] sm:$0xff] }
  0x13   :  { %114 = vperm.xlu1 %782, %v60_v15   ;;  %109 = vperm.xlu0 %781, %v59_v16   ;;  %v756_v37 = vld [vmem:[%s1115_s1 + $0x18] sm:$0xff]  ;;  %v310_v38 = vld [vmem:[%s1118_s4 + $0x48] sm:$0xff]  ;;  %v311_v40 = vld [vmem:[%s1118_s4 + $0x50] sm:$0xff] }
  0x14   :  { %99 = vperm.xlu2 %783, %v57_v17   ;;  %v313_v41 = vld [vmem:[%s1118_s4 + $0x60] sm:$0xff]  ;;  %v312_v42 = vld [vmem:[%s1118_s4 + $0x58] sm:$0xff]  ;;  %v314_v43 = vld [vmem:[%s1118_s4 + $0x68] sm:$0xff] }
  0x15   :  { %v757_v44 = vld [vmem:[%s1115_s1 + $0x20] sm:$0xff]  ;;  %v316_v45 = vld [vmem:[%s1118_s4 + $0x78] sm:$0xff]  ;;  %v315_v46 = vld [vmem:[%s1118_s4 + $0x70] sm:$0xff] }
  0x16   :  { %v510_v47 = vld [vmem:[%s1119_s5] sm:$0xff]  ;;  %v512_v48 = vld [vmem:[%s1119_s5 + $0x10] sm:$0xff]  ;;  %v511_v49 = vld [vmem:[%s1119_s5 + $0x8] sm:$0xff] }
  0x17   :  { %v513_v50 = vld [vmem:[%s1119_s5 + $0x18] sm:$0xff]  ;;  %v515_v51 = vld [vmem:[%s1119_s5 + $0x28] sm:$0xff]  ;;  %v514_v52 = vld [vmem:[%s1119_s5 + $0x20] sm:$0xff] }
  0x18   :  { %v516_v53 = vld [vmem:[%s1119_s5 + $0x30] sm:$0xff]  ;;  %v518_v54 = vld [vmem:[%s1119_s5 + $0x40] sm:$0xff]  ;;  %v517_v55 = vld [vmem:[%s1119_s5 + $0x38] sm:$0xff] }
  0x19   :  { %v519_v56 = vld [vmem:[%s1119_s5 + $0x48] sm:$0xff]  ;;  %v521_v57 = vld [vmem:[%s1119_s5 + $0x58] sm:$0xff]  ;;  %v520_v58 = vld [vmem:[%s1119_s5 + $0x50] sm:$0xff] }
  0x1a   :  { %v522_v59 = vld [vmem:[%s1119_s5 + $0x60] sm:$0xff]  ;;  %v524_v62 = vld [vmem:[%s1119_s5 + $0x70] sm:$0xff]  ;;  %v523_v63 = vld [vmem:[%s1119_s5 + $0x68] sm:$0xff] }
  0x1b   :  { %89 = vperm.xlu1 %782, %v55_v19   ;;  %104 = vperm.xlu0 %781, %v58_v18   ;;  %v525_v0 = vld [vmem:[%s1119_s5 + $0x78] sm:$0xff] }
  0x1c   :  { %94 = vperm.xlu2 %783, %v56_v20  }
  0x1d   :  { %714 = vmatmul.msk.bf16.gmra.mxu0 %vm187_vm0, %v754_v21  ;;  %719 = vmatmul.msk.bf16.gmra.mxu3 %vm187_vm0, %v759_v22 }
  0x23   :  { %84 = vperm.xlu1 %782, %v54_v23   ;;  %79 = vperm.xlu0 %781, %v53_v24  }
  0x24   :  { %69 = vperm.xlu2 %783, %v51_v25  }
  0x2b   :  { %319 = vperm.xlu1 %782, %v301_v26   ;;  %74 = vperm.xlu0 %781, %v52_v27  }
  0x2c   :  { %324 = vperm.xlu2 %783, %v302_v28  }
  0x2d   :  { %715 = vmatmul.msk.bf16.gmra.mxu0 %vm187_vm0, %v755_v29  ;;  %720 = vmatmul.msk.bf16.gmra.mxu3 %vm187_vm0, %v760_v30 }
  0x33   :  { %334 = vperm.xlu1 %782, %v304_v31   ;;  %329 = vperm.xlu0 %781, %v303_v32  }
  0x34   :  { %339 = vperm.xlu2 %783, %v305_v33  }
  0x3b   :  { %349 = vperm.xlu1 %782, %v307_v34   ;;  %344 = vperm.xlu0 %781, %v306_v35  }
  0x3c   :  { %354 = vperm.xlu2 %783, %v308_v36  }
  0x3d   :  { %716 = vmatmul.msk.bf16.gmra.mxu0 %vm187_vm0, %v756_v37 }
  0x43   :  { %364 = vperm.xlu1 %782, %v310_v38   ;;  %359 = vperm.xlu0 %781, %v309_v39  }
  0x44   :  { %369 = vperm.xlu2 %783, %v311_v40  }
  0x4b   :  { %379 = vperm.xlu1 %782, %v313_v41   ;;  %374 = vperm.xlu0 %781, %v312_v42  }
  0x4c   :  { %384 = vperm.xlu2 %783, %v314_v43  }
  0x4d   :  { %717 = vmatmul.msk.bf16.gmra.mxu0 %vm187_vm0, %v757_v44 }
  0x53   :  { %394 = vperm.xlu1 %782, %v316_v45   ;;  %389 = vperm.xlu0 %781, %v315_v46  }
  0x54   :  { %528 = vperm.xlu2 %783, %v510_v47  }
  0x5b   :  { %538 = vperm.xlu1 %782, %v512_v48   ;;  %533 = vperm.xlu0 %781, %v511_v49  }
  0x5c   :  { %543 = vperm.xlu2 %783, %v513_v50  }
  0x5d   :  { %v120_v60 = vpop.permute.xlu2 %119 }
  0x63   :  { %553 = vperm.xlu1 %782, %v515_v51   ;;  %548 = vperm.xlu0 %781, %v514_v52  }
  0x64   :  { %558 = vperm.xlu2 %783, %v516_v53  }
  0x66   :  { %v125_v1 = vpop.permute.xlu2 %124 }
  0x6b   :  { %568 = vperm.xlu1 %782, %v518_v54   ;;  %563 = vperm.xlu0 %781, %v517_v55  }
  0x6c   :  { %573 = vperm.xlu2 %783, %v519_v56  }
  0x6e   :  { %v100_v4 = vpop.permute.xlu2 %99 }
  0x73   :  { %583 = vperm.xlu1 %782, %v521_v57   ;;  %578 = vperm.xlu0 %781, %v520_v58  }
  0x74   :  { %588 = vperm.xlu2 %783, %v522_v59   ;;  %v130_v24 = vpop.permute.xlu1 %129 }
  0x75   :  { %v140_v61 = vpop.permute.xlu0 %139 }
  0x76   :  { %v95_v8 = vpop.permute.xlu2 %94 }
  0x7b   :  { %598 = vperm.xlu1 %782, %v524_v62   ;;  %593 = vperm.xlu0 %781, %v523_v63  }
  0x7c   :  { %603 = vperm.xlu2 %783, %v525_v0  }
  0x7d   :  { %v145_v2 = vpop.permute.xlu0 %144  ;;  %v135_v28 = vpop.permute.xlu1 %134 }
  0x7e   :  { %v70_v13 = vpop.permute.xlu2 %69 }
  0x85   :  { %v110_v3 = vpop.permute.xlu0 %109  ;;  %v115_v46 = vpop.permute.xlu1 %114 }
  0x8a   :  { %v221_v5 = vpop.f32.mrf.mxu0 }
  0x8b   :  { %v222_v14 = vadd.f32 %v221_v5, %v70_v13  ;;  %v764_v13 = vld [vmem:[%s1117_s3 + $0x18] sm:$0xff] }
  0x8d   :  { %v105_v6 = vpop.permute.xlu0 %104  ;;  %v261_v18 = vmax.f32 %v222_v14, 0.0  ;;  %v90_v48 = vpop.permute.xlu1 %89  ;;  %v768_v14 = vld [vmem:[%s1117_s3 + $0x38] sm:$0xff] }
  0x90   :  { %v246_v7 = vpop.f32.mrf.mxu3 }
  0x91   :  { %v247_v36 = vadd.f32 %v246_v7, %v120_v60  ;;  %v761_v7 = vld [vmem:[%s1117_s3] sm:$0xff] }
  0x92   :  { %v223_v9 = vpop.f32.mrf.mxu0 }
  0x93   :  { %v271_v41 = vmax.f32 %v247_v36, 0.0 }
  0x95   :  { %v1040_v10 = vpop.permute.xlu0 %79 }
  0x98   :  { %v248_v11 = vpop.f32.mrf.mxu3 }
  0x99   :  { %v249_v37 = vadd.f32 %v248_v11, %v125_v1  ;;  %v763_v11 = vld [vmem:[%s1117_s3 + $0x10] sm:$0xff] }
  0x9a   :  { %v226_v12 = vpop.f32.mrf.mxu0 }
  0x9b   :  { %v272_v42 = vmax.f32 %v249_v37, 0.0  ;;  %v227_v1 = vadd.f32 %v226_v12, %v1040_v10  ;;  %v766_v10 = vld [vmem:[%s1117_s3 + $0x28] sm:$0xff]  ;;  %v767_v12 = vld [vmem:[%s1117_s3 + $0x30] sm:$0xff] }
  0x9d   :  { %v75_v15 = vpop.permute.xlu0 %74  ;;  %v298_v45 = vpack.c.bf16 %v272_v42, %v271_v41  ;;  %v263_v5 = vmax.f32 %v227_v1, 0.0 }
  0x9e   :  { %v224_v16 = vadd.f32 %v223_v9, %v75_v15  ;;  %v762_v9 = vld [vmem:[%s1117_s3 + $0x8] sm:$0xff] }
  0xa0   :  { %v251_v17 = vpop.f32.mrf.mxu3  ;;  %v262_v19 = vmax.f32 %v224_v16, 0.0  ;;  %v325_v16 = vpop.permute.xlu2 %324 }
  0xa1   :  { %v252_v30 = vadd.f32 %v251_v17, %v130_v24 }
  0xa2   :  { %v228_v20 = vpop.f32.mrf.mxu0  ;;  %v1042_v21 = vpack.c.bf16 %v262_v19, %v261_v18 }
  0xa3   :  { %v273_v38 = vmax.f32 %v252_v30, 0.0 }
  0xa5   :  { %v330_v17 = vpop.permute.xlu0 %329 }
  0xa8   :  { %v253_v22 = vpop.f32.mrf.mxu3  ;;  %v340_v19 = vpop.permute.xlu2 %339 }
  0xa9   :  { %v254_v31 = vadd.f32 %v253_v22, %v135_v28 }
  0xaa   :  { %v231_v23 = vpop.f32.mrf.mxu0 }
  0xab   :  { %v274_v39 = vmax.f32 %v254_v31, 0.0  ;;  %v232_v59 = vadd.f32 %v231_v23, %v90_v48 }
  0xad   :  { %v299_v43 = vpack.c.bf16 %v274_v39, %v273_v38 }
  0xb0   :  { %v256_v25 = vpop.f32.mrf.mxu3  ;;  %v1071_v22 = vpop.permute.xlu2 %354 }
  0xb1   :  { %v257_v27 = vadd.f32 %v256_v25, %v140_v61  ;;  %v85_v61 = vpop.permute.xlu1 %84 }
  0xb2   :  { %v233_v26 = vpop.f32.mrf.mxu0  ;;  %v229_v62 = vadd.f32 %v228_v20, %v85_v61  ;;  %v345_v20 = vpop.permute.xlu0 %344 }
  0xb3   :  { %v275_v32 = vmax.f32 %v257_v27, 0.0  ;;  %v234_v56 = vadd.f32 %v233_v26, %v95_v8  ;;  %v765_v8 = vld [vmem:[%s1117_s3 + $0x20] sm:$0xff] }
  0xb5   :  { %v266_v63 = vmax.f32 %v234_v56, 0.0 }
  0xb8   :  { %v258_v29 = vpop.f32.mrf.mxu3  ;;  %v1073_v26 = vpop.permute.xlu2 %369 }
  0xb9   :  { %v259_v33 = vadd.f32 %v258_v29, %v145_v2  ;;  %v265_v2 = vmax.f32 %v232_v59, 0.0  ;;  %v320_v15 = vpop.permute.xlu1 %319 }
  0xba   :  { %v236_v34 = vpop.f32.mrf.mxu0  ;;  %v360_v23 = vpop.permute.xlu0 %359 }
  0xbb   :  { %v276_v35 = vmax.f32 %v259_v33, 0.0  ;;  %v237_v53 = vadd.f32 %v236_v34, %v100_v4  ;;  %v295_v4 = vpack.c.bf16 %v266_v63, %v265_v2 }
  0xbd   :  { %v300_v40 = vpack.c.bf16 %v276_v35, %v275_v32  ;;  %v267_v60 = vmax.f32 %v237_v53, 0.0 }
  0xbf   :  { %445 = vmatpush.bf16.msra.mxu1 %v300_v40  ;;  %771 = vmatpush.bf16.msra.mxu2 %v300_v40 }
  0xc0   :  { %v1079_v31 = vpop.permute.xlu2 %384 }
  0xc1   :  { %v335_v18 = vpop.permute.xlu1 %334 }
  0xc2   :  { %v238_v44 = vpop.f32.mrf.mxu0  ;;  %v1075_v29 = vpop.permute.xlu0 %374 }
  0xc3   :  { %446 = vmatpush.bf16.msra.mxu1 %v299_v43  ;;  %772 = vmatpush.bf16.msra.mxu2 %v299_v43  ;;  %v239_v51 = vadd.f32 %v238_v44, %v105_v6 }
  0xc5   :  { %v268_v57 = vmax.f32 %v239_v51, 0.0 }
  0xc7   :  { %447 = vmatpush.bf16.msra.mxu1 %v298_v45  ;;  %773 = vmatpush.bf16.msra.mxu2 %v298_v45  ;;  %v296_v0 = vpack.c.bf16 %v268_v57, %v267_v60 }
  0xc8   :  { %v529_v37 = vpop.permute.xlu2 %528 }
  0xca   :  { %v241_v47 = vpop.f32.mrf.mxu0  ;;  %v1081_v34 = vpop.permute.xlu0 %389 }
  0xcb   :  { %v242_v49 = vadd.f32 %v241_v47, %v110_v3  ;;  %v264_v3 = vmax.f32 %v229_v62, 0.0 }
  0xcd   :  { %v269_v54 = vmax.f32 %v242_v49, 0.0  ;;  %v294_v6 = vpack.c.bf16 %v264_v3, %v263_v5 }
  0xd0   :  { %v544_v43 = vpop.permute.xlu2 %543 }
  0xd2   :  { %v243_v50 = vpop.f32.mrf.mxu0  ;;  %v534_v39 = vpop.permute.xlu0 %533 }
  0xd3   :  { %v244_v52 = vadd.f32 %v243_v50, %v115_v46 }
  0xd5   :  { %v270_v55 = vmax.f32 %v244_v52, 0.0 }
  0xd7   :  { %v297_v58 = vpack.c.bf16 %v270_v55, %v269_v54 }
  0xd8   :  { %v559_v56 = vpop.permute.xlu2 %558 }
  0xd9   :  { %448 = vmatpush.bf16.msra.mxu1 %v297_v58  ;;  %774 = vmatpush.bf16.msra.mxu2 %v297_v58 }
  0xda   :  { %v549_v48 = vpop.permute.xlu0 %548 }
  0xdd   :  { %449 = vmatpush.bf16.msra.mxu1 %v296_v0  ;;  %775 = vmatpush.bf16.msra.mxu2 %v296_v0 }
  0xe1   :  { %450 = vmatpush.bf16.msra.mxu1 %v295_v4  ;;  %776 = vmatpush.bf16.msra.mxu2 %v295_v4 }
  0xe2   :  { %v564_v5 = vpop.permute.xlu0 %563 }
  0xe5   :  { %451 = vmatpush.bf16.msra.mxu1 %v294_v6  ;;  %777 = vmatpush.bf16.msra.mxu2 %v294_v6 }
  0xe9   :  { %452 = vmatpush.bf16.msra.mxu1 %v1042_v21  ;;  %778 = vmatpush.bf16.msra.mxu2 %v1042_v21  ;;  %v350_v21 = vpop.permute.xlu1 %349 }
  0xec   :  { %453 = vmatmul.bf16.vlgmr.msra.gmra.mxu1 %v761_v7  ;;  %473 = vmatmul.bf16.vlgmr.msra.gmra.mxu2 %v765_v8 }
  0xf1   :  { %v365_v25 = vpop.permute.xlu1 %364 }
  0xf9   :  { %v1077_v30 = vpop.permute.xlu1 %379 }
  0xfc   :  { %458 = vmatmul.bf16.gmra.mxu1 %v762_v9  ;;  %478 = vmatmul.bf16.gmra.mxu2 %v766_v10 }
 0x101   :  { %v1083_v35 = vpop.permute.xlu1 %394 }
 0x109   :  { %v539_v41 = vpop.permute.xlu1 %538 }
 0x10c   :  { %463 = vmatmul.bf16.gmra.mxu1 %v763_v11  ;;  %483 = vmatmul.bf16.gmra.mxu2 %v767_v12 }
 0x111   :  { %v554_v52 = vpop.permute.xlu1 %553 }
 0x119   :  { %v569_v10 = vpop.permute.xlu1 %568 }
 0x11c   :  { %468 = vmatmul.bf16.gmra.mxu1 %v764_v13  ;;  %488 = vmatmul.bf16.gmra.mxu2 %v768_v14 }
 0x169   :  { %v454_v24 = vpop.f32.mrf.mxu1 }
 0x16a   :  { %v455_v46 = vadd.f32 %v454_v24, %v320_v15  ;;  %v574_v15 = vpop.permute.xlu2 %573 }
 0x16c   :  { %v494_v53 = vmax.f32 %v455_v46, 0.0 }
 0x16e   :  { %v606_v61 = vmul.f32 %v529_v37, %v494_v53 }
 0x16f   :  { %v474_v27 = vpop.f32.mrf.mxu2 }
 0x170   :  { %v623_v6 = vsel %vm622_vm1, %v606_v61, 0.0  ;;  %v475_v12 = vadd.f32 %v474_v27, %v360_v23 }
 0x171   :  { %v456_v28 = vpop.f32.mrf.mxu1 }
 0x172   :  { %v457_v44 = vadd.f32 %v456_v28, %v325_v16  ;;  %v502_v28 = vmax.f32 %v475_v12, 0.0 }
 0x174   :  { %v495_v50 = vmax.f32 %v457_v44, 0.0 }
 0x176   :  { %v607_v57 = vmul.f32 %v534_v39, %v495_v50 }
 0x177   :  { %v476_v32 = vpop.f32.mrf.mxu2 }
 0x178   :  { %v624_v1 = vsel %vm622_vm1, %v607_v57, 0.0 }
 0x179   :  { %v459_v33 = vpop.f32.mrf.mxu1  ;;  %v625_v11 = vadd.f32 %v624_v1, %v623_v6 }
 0x17a   :  { %v460_v47 = vadd.f32 %v459_v33, %v330_v17 }
 0x17c   :  { %v496_v54 = vmax.f32 %v460_v47, 0.0 }
 0x17e   :  { %v608_v62 = vmul.f32 %v539_v41, %v496_v54 }
 0x17f   :  { %v479_v36 = vpop.f32.mrf.mxu2 }
 0x180   :  { %v626_v7 = vsel %vm622_vm1, %v608_v62, 0.0  ;;  %v480_v33 = vadd.f32 %v479_v36, %v1073_v26 }
 0x181   :  { %v461_v38 = vpop.f32.mrf.mxu1  ;;  %v627_v16 = vadd.f32 %v626_v7, %v625_v11 }
 0x182   :  { %v462_v51 = vadd.f32 %v461_v38, %v335_v18  ;;  %v477_v18 = vadd.f32 %v476_v32, %v365_v25  ;;  %v579_v25 = vpop.permute.xlu0 %578  ;;  %v504_v44 = vmax.f32 %v480_v33, 0.0 }
 0x184   :  { %v497_v58 = vmax.f32 %v462_v51, 0.0  ;;  %v503_v27 = vmax.f32 %v477_v18, 0.0  ;;  %v589_v51 = vpop.permute.xlu2 %588  ;;  %v616_v53 = vmul.f32 %v579_v25, %v504_v44 }
 0x186   :  { %v609_v2 = vmul.f32 %v544_v43, %v497_v58  ;;  %v614_v43 = vmul.f32 %v569_v10, %v502_v28  ;;  %v615_v36 = vmul.f32 %v574_v15, %v503_v27 }
 0x187   :  { %v481_v40 = vpop.f32.mrf.mxu2 }
 0x188   :  { %v628_v13 = vsel %vm622_vm1, %v609_v2, 0.0  ;;  %v482_v39 = vadd.f32 %v481_v40, %v1075_v29 }
 0x189   :  { %v464_v42 = vpop.f32.mrf.mxu1 }
 0x18a   :  { %v465_v55 = vadd.f32 %v464_v42, %v340_v19  ;;  %v594_v62 = vpop.permute.xlu0 %593 }
 0x18c   :  { %v498_v63 = vmax.f32 %v465_v55, 0.0  ;;  %v604_v6 = vpop.permute.xlu2 %603 }
 0x18e   :  { %v610_v8 = vmul.f32 %v549_v48, %v498_v63  ;;  %v584_v48 = vpop.permute.xlu1 %583 }
 0x18f   :  { %v484_v45 = vpop.f32.mrf.mxu2 }
 0x190   :  { %v630_v19 = vsel %vm622_vm1, %v610_v8, 0.0  ;;  %v485_v46 = vadd.f32 %v484_v45, %v1077_v30  ;;  %v640_v30 = vsel %vm622_vm1, %v615_v36, 0.0 }
 0x191   :  { %v466_v49 = vpop.f32.mrf.mxu1 }
 0x192   :  { %v467_v59 = vadd.f32 %v466_v49, %v345_v20  ;;  %v505_v49 = vmax.f32 %v482_v39, 0.0  ;;  %v506_v54 = vmax.f32 %v485_v46, 0.0 }
 0x194   :  { %v499_v3 = vmax.f32 %v467_v59, 0.0  ;;  %v617_v45 = vmul.f32 %v584_v48, %v505_v49 }
 0x196   :  { %v611_v14 = vmul.f32 %v554_v52, %v499_v3  ;;  %v638_v52 = vsel %vm622_vm1, %v614_v43, 0.0  ;;  %v599_v3 = vpop.permute.xlu1 %598 }
 0x197   :  { %v486_v60 = vpop.f32.mrf.mxu2 }
 0x198   :  { %v632_v37 = vsel %vm622_vm1, %v611_v14, 0.0 }
 0x199   :  { %v469_v0 = vpop.f32.mrf.mxu1 }
 0x19a   :  { %v470_v4 = vadd.f32 %v469_v0, %v350_v21  ;;  %v629_v21 = vadd.f32 %v628_v13, %v627_v16  ;;  %v644_v0 = vsel %vm622_vm1, %v617_v45, 0.0 }
 0x19c   :  { %v500_v9 = vmax.f32 %v470_v4, 0.0  ;;  %v631_v23 = vadd.f32 %v630_v19, %v629_v21  ;;  %v661_v19 = vstv %s1120_s6 }
 0x19e   :  { %v612_v20 = vmul.f32 %v559_v56, %v500_v9  ;;  %v633_v32 = vadd.f32 %v632_v37, %v631_v23 }
 0x19f   :  { %v489_v17 = vpop.f32.mrf.mxu2 }
 0x1a0   :  { %v634_v41 = vsel %vm622_vm1, %v612_v20, 0.0  ;;  %v490_v55 = vadd.f32 %v489_v17, %v1081_v34 }
 0x1a1   :  { %v471_v24 = vpop.f32.mrf.mxu1  ;;  %v635_v26 = vadd.f32 %v634_v41, %v633_v32 }
 0x1a2   :  { %v472_v38 = vadd.f32 %v471_v24, %v1071_v22  ;;  %v487_v22 = vadd.f32 %v486_v60, %v1079_v31  ;;  %v642_v31 = vsel %vm622_vm1, %v616_v53, 0.0  ;;  %v618_v60 = vmul.f32 %v589_v51, %v506_v54 }
 0x1a3   :  { %v508_v61 = vmax.f32 %v490_v55, 0.0 }
 0x1a4   :  { %v501_v42 = vmax.f32 %v472_v38, 0.0  ;;  %v507_v57 = vmax.f32 %v487_v22, 0.0  ;;  %v646_v4 = vsel %vm622_vm1, %v618_v60, 0.0 }
 0x1a6   :  { %v613_v47 = vmul.f32 %v564_v5, %v501_v42  ;;  %v619_v1 = vmul.f32 %v594_v62, %v507_v57  ;;  %v620_v5 = vmul.f32 %v599_v3, %v508_v61 }
 0x1a7   :  { %v491_v40 = vpop.f32.mrf.mxu2 }
 0x1a8   :  { %v636_v50 = vsel %vm622_vm1, %v613_v47, 0.0  ;;  %v492_v58 = vadd.f32 %v491_v40, %v1083_v35  ;;  %v648_v35 = vsel %vm622_vm1, %v619_v1, 0.0  ;;  %v650_v10 = vsel %vm622_vm1, %v620_v5, 0.0 }
 0x1a9   :  { %v637_v29 = vadd.f32 %v636_v50, %v635_v26 }
 0x1aa   :  { %v509_v2 = vmax.f32 %v492_v58, 0.0 }
 0x1ab   :  { %v639_v56 = vadd.f32 %v638_v52, %v637_v29 }
 0x1ac   :  { %v621_v8 = vmul.f32 %v604_v6, %v509_v2 }
 0x1ad   :  { %v641_v59 = vadd.f32 %v640_v30, %v639_v56 }
 0x1ae   :  { %v652_v12 = vsel %vm622_vm1, %v621_v8, 0.0 }
 0x1af   :  { %v643_v63 = vadd.f32 %v642_v31, %v641_v59 }
 0x1b1   :  { %v645_v34 = vadd.f32 %v644_v0, %v643_v63 }
 0x1b3   :  { %v647_v7 = vadd.f32 %v646_v4, %v645_v34 }
 0x1b5   :  { %v649_v9 = vadd.f32 %v648_v35, %v647_v7 }
 0x1b7   :  { %v651_v11 = vadd.f32 %v650_v10, %v649_v9 }
 0x1b9   :  { %v653_v13 = vadd.f32 %v652_v12, %v651_v11 }
 0x1bb   :  { %v654_v14 = vrot.slane %v653_v13, 4 }
 0x1bd   :  { %v655_v15 = vadd.f32 %v654_v14, %v653_v13 }
 0x1bf   :  { %v656_v16 = vrot.slane %v655_v15, 2 }
 0x1c1   :  { %v657_v17 = vadd.f32 %v656_v16, %v655_v15 }
 0x1c3   :  { %v658_v18 = vrot.slane %v657_v17, 1 }
 0x1c5   :  { %v659_v20 = vadd.f32 %v658_v18, %v657_v17 }
 0x1c7   :  { %v662_v21 = vadd.f32 %v661_v19, %v659_v20 }
 0x1c9   :  { %664 = vst.msk [vmem:[#allocation3] sm:$0x1] %vm663_vm2, %v662_v21 }
 0x1ca   :  { %675 = dma.vmem_to_hbm [thread:$0]  %s671_s10, 16, %s673_s13, [#allocation4]  }
 0x1cb   :  { %808 = dma.done.wait [#allocation4], 16  }
 0x1cc   :  { %809 = vsyncadd [#allocation4], 4294967280 }
 0x1cd   :  { %680 = vsyncpa [#allocation4], 1 }

</bundles_post_ra>
